<compile_context>
chip_gen: v5e
topology: v5e:2x2
jax: 0.10.0
libtpu: 0.0.40
codegen_flags: <defaults>
</compile_context>

<pallas_src>
import functools
import math

import jax
import jax.numpy as jnp
from jax.experimental import pallas as pl
from jax.experimental.pallas import tpu as pltpu


# ------------------------------ sizing helpers --------------------------------
def _vmem_budget_bytes():
    """Generation-aware scoped-VMEM budget (leaves headroom for Mosaic scratch)."""
    cap = 128 * 1024 * 1024
    try:
        info = pltpu.get_tpu_info()
        cap = int(getattr(info, "vmem_capacity_bytes", cap) or cap)
    except Exception:
        pass
    # ~96 MiB on 128-MiB parts (v5e/v6e), ~48 MiB on 64-MiB v7x.
    return max(32 * 1024 * 1024, min(cap * 3 // 4, 100 * 1024 * 1024))


def _row_tile(m, target=512):
    """Row tile for the linear kernels: multiple of 8, and split so a parallel
    grid axis has >=2 programs when possible (keeps both cores busy on v7x)."""
    tm = min(target, m)
    if tm == m and m > 8:
        half = (m + 1) // 2
        tm = ((half + 7) // 8) * 8
        if tm >= m:
            tm = m
    return tm


def _seq_tile(s, target):
    """Sequence tile that must divide S exactly (softmax must not see padded keys)."""
    if s <= target:
        return s
    if s % target == 0:
        return target
    for t in range(min(target, s), 0, -1):
        if s % t == 0 and t % 8 == 0:
            return t
    return s


# ------------------------- fused QKV projection (self-attn) -------------------
def _qkv_fused_kernel(x_ref, w_ref, b_ref, q_ref, k_ref, v_ref, *, inner):
    """One matmul against the concatenated [wq|wk|wv] weight; q comes out
    pre-scaled because wq/bq were pre-scaled in the wrapper."""
    x = x_ref[...].astype(w_ref.dtype)
    y = jnp.dot(x, w_ref[...], preferred_element_type=jnp.float32)
    y = y + b_ref[...].astype(jnp.float32)
    q_ref[...] = y[:, :inner].astype(q_ref.dtype)
    k_ref[...] = y[:, inner:2 * inner].astype(k_ref.dtype)
    v_ref[...] = y[:, 2 * inner:].astype(v_ref.dtype)


def qkv_projection_fused(x, w_cat, b_cat, *, inner, out_dtype, row_tile, vmem_limit):
    """x: [M, hidden] streamed once; w_cat: [hidden, 3*inner] (VMEM-resident)."""
    m, in_dim = x.shape
    tm = _row_tile(m, row_tile)
    o_spec = pl.BlockSpec((tm, inner), lambda i: (i, 0))
    return pl.pallas_call(
        functools.partial(_qkv_fused_kernel, inner=inner),
        out_shape=tuple(jax.ShapeDtypeStruct((m, inner), out_dtype) for _ in range(3)),
        grid=(pl.cdiv(m, tm),),
        in_specs=[pl.BlockSpec((tm, in_dim), lambda i: (i, 0)),
                  pl.BlockSpec((in_dim, 3 * inner), lambda i: (0, 0)),  # resident
                  pl.BlockSpec((1, 3 * inner), lambda i: (0, 0))],
        out_specs=(o_spec, o_spec, o_spec),
        compiler_params=pltpu.CompilerParams(
            dimension_semantics=("parallel",),
            vmem_limit_bytes=vmem_limit),
    )(x, w_cat, b_cat)


# ----------------------- split QKV projection (cross-attn) --------------------
def _qkv_split_kernel(xq_ref, xk_ref, xv_ref, wq_ref, wk_ref, wv_ref,
                      bq_ref, bk_ref, bv_ref, q_ref, k_ref, v_ref):
    def proj(x_ref, w_ref, b_ref):
        x = x_ref[...].astype(w_ref.dtype)
        return (jnp.dot(x, w_ref[...], preferred_element_type=jnp.float32)
                + b_ref[...].astype(jnp.float32))

    # wq/bq are pre-scaled by 1/sqrt(D) in the wrapper.
    q_ref[...] = proj(xq_ref, wq_ref, bq_ref).astype(q_ref.dtype)
    k_ref[...] = proj(xk_ref, wk_ref, bk_ref).astype(k_ref.dtype)
    v_ref[...] = proj(xv_ref, wv_ref, bv_ref).astype(v_ref.dtype)


def qkv_projection(xq, xk, xv, wq, wk, wv, bq, bk, bv, *, out_dtype, row_tile,
                   vmem_limit):
    """xq/xk/xv: [M, hidden] -> q/k/v: [M, inner] (single pallas_call)."""
    m, in_dim = xq.shape
    inner = wq.shape[1]
    tm = _row_tile(m, row_tile)
    x_spec = pl.BlockSpec((tm, in_dim), lambda i: (i, 0))
    w_spec = pl.BlockSpec((in_dim, inner), lambda i: (0, 0))   # resident across rows
    b_spec = pl.BlockSpec((1, inner), lambda i: (0, 0))
    o_spec = pl.BlockSpec((tm, inner), lambda i: (i, 0))
    # TODO(synk): add a hidden-dim (K) grid axis + f32 accumulator for very wide
    # models so VMEM stays bounded independent of hidden size.
    return pl.pallas_call(
        _qkv_split_kernel,
        out_shape=tuple(jax.ShapeDtypeStruct((m, inner), out_dtype) for _ in range(3)),
        grid=(pl.cdiv(m, tm),),
        in_specs=[x_spec, x_spec, x_spec, w_spec, w_spec, w_spec,
                  b_spec, b_spec, b_spec],
        out_specs=(o_spec, o_spec, o_spec),
        compiler_params=pltpu.CompilerParams(
            dimension_semantics=("parallel",),
            vmem_limit_bytes=vmem_limit),
    )(xq, xk, xv, wq, wk, wv,
      bq.reshape(1, inner), bk.reshape(1, inner), bv.reshape(1, inner))


# ------------------------------ output linear ---------------------------------
def _linear_kernel(x_ref, w_ref, b_ref, o_ref):
    x = x_ref[...].astype(w_ref.dtype)
    y = jnp.dot(x, w_ref[...], preferred_element_type=jnp.float32)
    o_ref[...] = (y + b_ref[...].astype(jnp.float32)).astype(o_ref.dtype)


def linear(x, w, b, *, out_dtype, row_tile, vmem_limit):
    """x: [M, In] @ w: [In, Out] + b -> [M, Out], row-tiled over M."""
    m, in_dim = x.shape
    out_dim = w.shape[1]
    tm = _row_tile(m, row_tile)
    return pl.pallas_call(
        _linear_kernel,
        out_shape=jax.ShapeDtypeStruct((m, out_dim), out_dtype),
        grid=(pl.cdiv(m, tm),),
        in_specs=[pl.BlockSpec((tm, in_dim), lambda i: (i, 0)),
                  pl.BlockSpec((in_dim, out_dim), lambda i: (0, 0)),
                  pl.BlockSpec((1, out_dim), lambda i: (0, 0))],
        out_specs=pl.BlockSpec((tm, out_dim), lambda i: (i, 0)),
        compiler_params=pltpu.CompilerParams(
            dimension_semantics=("parallel",),
            vmem_limit_bytes=vmem_limit),
    )(x, w, b.reshape(1, out_dim))


# --------------------------- flash attention kernel ---------------------------
def _flash_attn_kernel(*refs, heads, head_dim, has_pb):
    if has_pb:
        (q_ref, k_ref, v_ref, mask_ref, pb_ref, o_ref,
         qh_sc, m_sc, l_sc, acc_sc) = refs
    else:
        (q_ref, k_ref, v_ref, mask_ref, o_ref,
         qh_sc, m_sc, l_sc, acc_sc) = refs
        pb_ref = None

    ki = pl.program_id(2)

    @pl.when(ki == 0)
    def _init():
        m_sc[...] = jnp.full(m_sc.shape, -jnp.inf, dtype=m_sc.dtype)
        l_sc[...] = jnp.zeros(l_sc.shape, dtype=l_sc.dtype)
        acc_sc[...] = jnp.zeros(acc_sc.shape, dtype=acc_sc.dtype)
        # Hoist the per-head q lane-slices once per q tile (not per kv step).
        q = q_ref[0]
        for h in range(heads):
            qh_sc[h] = q[:, h * head_dim:(h + 1) * head_dim]

    k = k_ref[0]                                    # (tk, H*D) bf16
    v = v_ref[0]                                    # (tk, H*D) bf16
    add_mask = mask_ref[0, 0].astype(jnp.float32)   # (tq, tk) additive mask

    for h in range(heads):                          # static unroll over heads
        lo = h * head_dim
        # scores_h = q_h @ k_h^T (contraction over head_dim), f32 accumulation.
        s = jax.lax.dot_general(qh_sc[h], k[:, lo:lo + head_dim],
                                (((1,), (1,)), ((), ())),
                                preferred_element_type=jnp.float32)   # (tq, tk)
        if pb_ref is not None:
            s = s + pb_ref[0, h].astype(jnp.float32)
        s = s + add_mask

        m_prev = m_sc[h]                                              # (tq, 1)
        m_new = jnp.maximum(m_prev, jnp.max(s, axis=-1, keepdims=True))
        alpha = jnp.exp(m_prev - m_new)
        # f32 exp everywhere (a bf16 exp is a v6e/v7x-only micro-opt; v5e has no
        # bf16 EUP), feeding a bf16 p into the MXU with f32 accumulation.
        p = jnp.exp(s - m_new)
        l_sc[h] = alpha * l_sc[h] + jnp.sum(p, axis=-1, keepdims=True)
        pv = jnp.dot(p.astype(v.dtype), v[:, lo:lo + head_dim],
                     preferred_element_type=jnp.float32)              # (tq, D)
        acc_sc[h] = alpha * acc_sc[h] + pv
        m_sc[h] = m_new

    @pl.when(ki == pl.num_programs(2) - 1)
    def _finalize():
        # Assemble the normalized (tq, H*D) slab -> ONE lane-dense store.
        outs = []
        for h in range(heads):
            inv_l = pl.reciprocal(l_sc[h], approx=True)
            outs.append(acc_sc[h] * inv_l)
        o_ref[0] = jnp.concatenate(outs, axis=-1).astype(o_ref.dtype)


def flash_attention(q, k, v, mask, position_bias, *, heads_num, head_dim,
                    out_dtype, q_tile=None, kv_tile=None, vmem_limit=None):
    """q/k/v: [B, S, H*D]; mask: [B, 1, S, S]; position_bias: [1, H, S, S] or None.

    mask / position_bias are additive and already in the (bf16) streaming dtype;
    the 1/sqrt(D) scale is pre-folded into q and position_bias.
    """
    B, S, inner = q.shape
    if vmem_limit is None:
        vmem_limit = _vmem_budget_bytes()
    if q_tile is None:
        q_tile = 512 if vmem_limit >= 80 * 1024 * 1024 else 256
    if kv_tile is None:
        kv_tile = 256
    tq = _seq_tile(S, q_tile)
    tk = _seq_tile(S, kv_tile)
    grid = (B, S // tq, S // tk)   # KV axis last ("arbitrary": carries accumulators)

    in_specs = [
        pl.BlockSpec((1, tq, inner), lambda b, qi, ki: (b, qi, 0)),
        pl.BlockSpec((1, tk, inner), lambda b, qi, ki: (b, ki, 0)),
        pl.BlockSpec((1, tk, inner), lambda b, qi, ki: (b, ki, 0)),
        pl.BlockSpec((1, 1, tq, tk), lambda b, qi, ki: (b, 0, qi, ki)),
    ]
    inputs = [q, k, v, mask]
    has_pb = position_bias is not None
    if has_pb:   # specialized variant: no zero-bias array is ever streamed
        # TODO(synk): block position_bias over qi only (index (0,0,qi,0)) and take
        # the kv chunk in-kernel to cut its HBM re-streaming by the batch factor,
        # once dynamic minor-dim ref slices are validated on the target toolchain.
        in_specs.append(
            pl.BlockSpec((1, heads_num, tq, tk), lambda b, qi, ki: (0, 0, qi, ki)))
        inputs.append(position_bias)

    kernel = functools.partial(_flash_attn_kernel, heads=heads_num,
                               head_dim=head_dim, has_pb=has_pb)
    return pl.pallas_call(
        kernel,
        out_shape=jax.ShapeDtypeStruct((B, S, inner), out_dtype),
        grid=grid,
        in_specs=in_specs,
        out_specs=pl.BlockSpec((1, tq, inner), lambda b, qi, ki: (b, qi, 0)),
        scratch_shapes=[
            pltpu.VMEM((heads_num, tq, head_dim), q.dtype),       # hoisted q heads
            pltpu.VMEM((heads_num, tq, 1), jnp.float32),          # running max
            pltpu.VMEM((heads_num, tq, 1), jnp.float32),          # running sum
            pltpu.VMEM((heads_num, tq, head_dim), jnp.float32),   # output accumulator
        ],
        compiler_params=pltpu.CompilerParams(
            dimension_semantics=("parallel", "parallel", "arbitrary"),
            vmem_limit_bytes=vmem_limit),
    )(*inputs)


# --------------------------- full module forward ------------------------------
def multi_headed_attention(params, key, value, query, mask, position_bias=None,
                           *, heads_num, per_head_size, with_scale=True,
                           compute_dtype=jnp.bfloat16, row_tile=512,
                           q_tile=None, kv_tile=None):
    """Mirrors MultiHeadedAttention.forward (inference mode: dropout = identity)."""
    B, S, hidden = query.shape
    inner = heads_num * per_head_size
    M = B * S
    cd = compute_dtype
    f32 = jnp.float32
    scale = (1.0 / math.sqrt(float(per_head_size))) if with_scale else 1.0
    vmem_limit = _vmem_budget_bytes()

    # Parameters are cast to the compute dtype once per call (do this at param
    # load in a real model). 1/sqrt(D) is folded into wq/bq so the kernels never
    # multiply by it.
    wq = (params["wq"].astype(f32) * scale).astype(cd)
    bq = (params["bq"].astype(f32) * scale).astype(cd)
    wk = params["wk"].astype(cd)
    bk = params["bk"].astype(cd)
    wv = params["wv"].astype(cd)
    bv = params["bv"].astype(cd)
    wo = params["wo"].astype(cd)
    bo = params["bo"].astype(cd)

    # linear_layers[0] -> query, [1] -> key, [2] -> value, matching
    # zip(self.linear_layers, (query, key, value)) in the PyTorch code.
    if (key is query) and (value is query):
        # Self-attention: stream the activations ONCE against [wq|wk|wv].
        w_cat = jnp.concatenate([wq, wk, wv], axis=1)          # (hidden, 3*inner)
        b_cat = jnp.concatenate([bq, bk, bv]).reshape(1, 3 * inner)
        q_flat, k_flat, v_flat = qkv_projection_fused(
            query.reshape(M, hidden), w_cat, b_cat, inner=inner,
            out_dtype=cd, row_tile=row_tile, vmem_limit=vmem_limit)
    else:
        q_flat, k_flat, v_flat = qkv_projection(
            query.reshape(M, hidden), key.reshape(M, hidden), value.reshape(M, hidden),
            wq, wk, wv, bq, bk, bv,
            out_dtype=cd, row_tile=row_tile, vmem_limit=vmem_limit)

    q = q_flat.reshape(B, S, inner)   # leading-dim-only reshapes (free)
    k = k_flat.reshape(B, S, inner)
    v = v_flat.reshape(B, S, inner)

    # Module semantics: scores = (q k^T + position_bias) / sqrt(D) + mask.
    # q is pre-scaled, so the (small) bias is pre-scaled here to match.
    # mask / bias are streamed in bf16 (-10000 rounds to ~-9984, equivalent
    # after softmax).
    pb = None
    if position_bias is not None:
        pb = (position_bias.astype(f32) * scale).astype(cd)

    ctx = flash_attention(q, k, v, mask.astype(cd), pb,
                          heads_num=heads_num, head_dim=per_head_size,
                          out_dtype=cd, q_tile=q_tile, kv_tile=kv_tile,
                          vmem_limit=vmem_limit)

    # TODO(synk): training-mode dropout on the attention probabilities is not implemented.

    out = linear(ctx.reshape(M, inner), wo, bo,
                 out_dtype=query.dtype, row_tile=row_tile, vmem_limit=vmem_limit)
    return out.reshape(B, S, hidden)


# --------------------------------- main ---------------------------------------
if __name__ == "__main__":
    hidden_size = 32
    heads_num = 4
    per_head_size = 8
    inner = heads_num * per_head_size
    batch, seq = 2, 256      # seq chosen so tq=tk=128 exercises multi-step online softmax

    root = jax.random.PRNGKey(0)
    keys = jax.random.split(root, 12)

    def init_linear(kw, kb, fan_in, fan_out):
        # nn.Linear stores weight as [out, in]; we keep [in, out] for x @ W.
        bound = 1.0 / math.sqrt(fan_in)
        w = jax.random.uniform(kw, (fan_in, fan_out), jnp.float32, -bound, bound)
        b = jax.random.uniform(kb, (fan_out,), jnp.float32, -bound, bound)
        return w, b

    wq, bq = init_linear(keys[0], keys[1], hidden_size, inner)
    wk, bk = init_linear(keys[2], keys[3], hidden_size, inner)
    wv, bv = init_linear(keys[4], keys[5], hidden_size, inner)
    wo, bo = init_linear(keys[6], keys[7], inner, hidden_size)
    params = dict(wq=wq, bq=bq, wk=wk, bk=bk, wv=wv, bv=bv, wo=wo, bo=bo)

    key_in   = jax.random.normal(keys[8],  (batch, seq, hidden_size), jnp.float32)
    value_in = jax.random.normal(keys[9],  (batch, seq, hidden_size), jnp.float32)
    query_in = jax.random.normal(keys[10], (batch, seq, hidden_size), jnp.float32)

    # Additive attention mask: 0 for visible, -10000 for masked (causal here).
    causal = jnp.tril(jnp.ones((seq, seq), jnp.float32))
    mask = ((1.0 - causal) * -10000.0)[None, None, :, :]
    mask = jnp.broadcast_to(mask, (batch, 1, seq, seq))
    position_bias = 0.1 * jax.random.normal(keys[11], (1, heads_num, seq, seq),
                                            jnp.float32)

    # Pure-JAX f32 reference mirroring the PyTorch module.
    def ref_fwd(key_x, value_x, query_x):
        def lin(x, w, b):
            return x @ w + b
        def sh(x):
            return x.reshape(batch, seq, heads_num, per_head_size).transpose(0, 2, 1, 3)
        q = sh(lin(query_x, wq, bq))
        k = sh(lin(key_x, wk, bk))
        v = sh(lin(value_x, wv, bv))
        s = jnp.einsum("bhqd,bhkd->bhqk", q, k)
        s = s + position_bias
        s = s / math.sqrt(float(per_head_size))
        s = s + mask
        p = jax.nn.softmax(s, axis=-1)
        c = jnp.einsum("bhqk,bhkd->bhqd", p, v)
        c = c.transpose(0, 2, 1, 3).reshape(batch, seq, inner)
        return lin(c, wo, bo)

    run = functools.partial(
        multi_headed_attention, params,
        heads_num=heads_num, per_head_size=per_head_size, with_scale=True,
        compute_dtype=jnp.bfloat16, q_tile=128, kv_tile=128)

    # Cross-attention path (three separate projection inputs).
    out = jax.block_until_ready(run(key_in, value_in, query_in, mask, position_bias))
    ref = ref_fwd(key_in, value_in, query_in)
    assert out.shape == (batch, seq, hidden_size)
    max_err = float(jnp.max(jnp.abs(out - ref)))
    # bf16 matmul inputs + bf16-streamed mask/bias + approximate reciprocal.
    assert jnp.allclose(out, ref, atol=1e-1, rtol=1e-1), max_err

    # Self-attention path (fused activation stream + concatenated QKV weight).
    out_self = jax.block_until_ready(run(query_in, query_in, query_in, mask,
                                         position_bias))
    ref_self = ref_fwd(query_in, query_in, query_in)
    max_err_self = float(jnp.max(jnp.abs(out_self - ref_self)))
    assert jnp.allclose(out_self, ref_self, atol=1e-1, rtol=1e-1), max_err_self

    print("KERNEL_OK")
</pallas_src>

<mosaic_0001>
module attributes {stable_mosaic.version = 11 : i64} {
  func.func @_qkv_split_kernel(%arg0: i32, %arg1: memref<256x32xf32, #tpu.memory_space<vmem>>, %arg2: memref<256x32xf32, #tpu.memory_space<vmem>>, %arg3: memref<256x32xf32, #tpu.memory_space<vmem>>, %arg4: memref<32x32xbf16, #tpu.memory_space<vmem>>, %arg5: memref<32x32xbf16, #tpu.memory_space<vmem>>, %arg6: memref<32x32xbf16, #tpu.memory_space<vmem>>, %arg7: memref<1x32xbf16, #tpu.memory_space<vmem>>, %arg8: memref<1x32xbf16, #tpu.memory_space<vmem>>, %arg9: memref<1x32xbf16, #tpu.memory_space<vmem>>, %arg10: memref<256x32xbf16, #tpu.memory_space<vmem>>, %arg11: memref<256x32xbf16, #tpu.memory_space<vmem>>, %arg12: memref<256x32xbf16, #tpu.memory_space<vmem>>) attributes {dimension_semantics = [#tpu.dimension_semantics<parallel>], iteration_bounds = array<i64: 2>, scalar_prefetch = 0 : i64, scratch_operands = 0 : i64, tpu.core_type = #tpu.core_type<tc>, window_params = [{transform_indices = @transform_0, window_bounds = array<i64: 256, 32>}, {transform_indices = @transform_1, window_bounds = array<i64: 256, 32>}, {transform_indices = @transform_2, window_bounds = array<i64: 256, 32>}, {pipeline_mode = #tpu.pipeline_mode<synchronous>, transform_indices = @transform_3, window_bounds = array<i64: 32, 32>}, {pipeline_mode = #tpu.pipeline_mode<synchronous>, transform_indices = @transform_4, window_bounds = array<i64: 32, 32>}, {pipeline_mode = #tpu.pipeline_mode<synchronous>, transform_indices = @transform_5, window_bounds = array<i64: 32, 32>}, {pipeline_mode = #tpu.pipeline_mode<synchronous>, transform_indices = @transform_6, window_bounds = array<i64: 1, 32>}, {pipeline_mode = #tpu.pipeline_mode<synchronous>, transform_indices = @transform_7, window_bounds = array<i64: 1, 32>}, {pipeline_mode = #tpu.pipeline_mode<synchronous>, transform_indices = @transform_8, window_bounds = array<i64: 1, 32>}, {transform_indices = @transform_9, window_bounds = array<i64: 256, 32>}, {transform_indices = @transform_10, window_bounds = array<i64: 256, 32>}, {transform_indices = @transform_11, window_bounds = array<i64: 256, 32>}]} {
    %c0 = arith.constant 0 : index
    %c0_0 = arith.constant 0 : index
    %0 = vector.load %arg1[%c0, %c0_0] : memref<256x32xf32, #tpu.memory_space<vmem>>, vector<256x32xf32>
    %1 = arith.truncf %0 : vector<256x32xf32> to vector<256x32xbf16>
    %c0_1 = arith.constant 0 : index
    %c0_2 = arith.constant 0 : index
    %2 = vector.load %arg4[%c0_1, %c0_2] : memref<32x32xbf16, #tpu.memory_space<vmem>>, vector<32x32xbf16>
    %cst = arith.constant dense<0.000000e+00> : vector<256x32xf32>
    %3 = tpu.matmul %1, %2, %cst {dimension_numbers = #tpu.dot_dimension_numbers<[1], [0], [0], [1], [0, 0, 1, 1], [], []>} : vector<256x32xbf16>, vector<32x32xbf16>, vector<256x32xf32> -> vector<256x32xf32>
    %c0_3 = arith.constant 0 : index
    %c0_4 = arith.constant 0 : index
    %4 = vector.load %arg7[%c0_3, %c0_4] : memref<1x32xbf16, #tpu.memory_space<vmem>>, vector<1x32xbf16>
    %5 = arith.extf %4 : vector<1x32xbf16> to vector<1x32xf32>
    %6 = vector.broadcast %5 : vector<1x32xf32> to vector<256x32xf32>
    %7 = arith.addf %3, %6 : vector<256x32xf32>
    %8 = arith.truncf %7 : vector<256x32xf32> to vector<256x32xbf16>
    %c0_5 = arith.constant 0 : index
    %c0_6 = arith.constant 0 : index
    %9 = vector.load %arg10[%c0_5, %c0_6] : memref<256x32xbf16, #tpu.memory_space<vmem>>, vector<256x32xbf16>
    tpu.vector_store %arg10[%c0_5, %c0_6], %8 {strides = array<i32>} : memref<256x32xbf16, #tpu.memory_space<vmem>>, vector<256x32xbf16>,
    %c0_7 = arith.constant 0 : index
    %c0_8 = arith.constant 0 : index
    %10 = vector.load %arg2[%c0_7, %c0_8] : memref<256x32xf32, #tpu.memory_space<vmem>>, vector<256x32xf32>
    %11 = arith.truncf %10 : vector<256x32xf32> to vector<256x32xbf16>
    %c0_9 = arith.constant 0 : index
    %c0_10 = arith.constant 0 : index
    %12 = vector.load %arg5[%c0_9, %c0_10] : memref<32x32xbf16, #tpu.memory_space<vmem>>, vector<32x32xbf16>
    %cst_11 = arith.constant dense<0.000000e+00> : vector<256x32xf32>
    %13 = tpu.matmul %11, %12, %cst_11 {dimension_numbers = #tpu.dot_dimension_numbers<[1], [0], [0], [1], [0, 0, 1, 1], [], []>} : vector<256x32xbf16>, vector<32x32xbf16>, vector<256x32xf32> -> vector<256x32xf32>
    %c0_12 = arith.constant 0 : index
    %c0_13 = arith.constant 0 : index
    %14 = vector.load %arg8[%c0_12, %c0_13] : memref<1x32xbf16, #tpu.memory_space<vmem>>, vector<1x32xbf16>
    %15 = arith.extf %14 : vector<1x32xbf16> to vector<1x32xf32>
    %16 = vector.broadcast %15 : vector<1x32xf32> to vector<256x32xf32>
    %17 = arith.addf %13, %16 : vector<256x32xf32>
    %18 = arith.truncf %17 : vector<256x32xf32> to vector<256x32xbf16>
    %c0_14 = arith.constant 0 : index
    %c0_15 = arith.constant 0 : index
    %19 = vector.load %arg11[%c0_14, %c0_15] : memref<256x32xbf16, #tpu.memory_space<vmem>>, vector<256x32xbf16>
    tpu.vector_store %arg11[%c0_14, %c0_15], %18 {strides = array<i32>} : memref<256x32xbf16, #tpu.memory_space<vmem>>, vector<256x32xbf16>,
    %c0_16 = arith.constant 0 : index
    %c0_17 = arith.constant 0 : index
    %20 = vector.load %arg3[%c0_16, %c0_17] : memref<256x32xf32, #tpu.memory_space<vmem>>, vector<256x32xf32>
    %21 = arith.truncf %20 : vector<256x32xf32> to vector<256x32xbf16>
    %c0_18 = arith.constant 0 : index
    %c0_19 = arith.constant 0 : index
    %22 = vector.load %arg6[%c0_18, %c0_19] : memref<32x32xbf16, #tpu.memory_space<vmem>>, vector<32x32xbf16>
    %cst_20 = arith.constant dense<0.000000e+00> : vector<256x32xf32>
    %23 = tpu.matmul %21, %22, %cst_20 {dimension_numbers = #tpu.dot_dimension_numbers<[1], [0], [0], [1], [0, 0, 1, 1], [], []>} : vector<256x32xbf16>, vector<32x32xbf16>, vector<256x32xf32> -> vector<256x32xf32>
    %c0_21 = arith.constant 0 : index
    %c0_22 = arith.constant 0 : index
    %24 = vector.load %arg9[%c0_21, %c0_22] : memref<1x32xbf16, #tpu.memory_space<vmem>>, vector<1x32xbf16>
    %25 = arith.extf %24 : vector<1x32xbf16> to vector<1x32xf32>
    %26 = vector.broadcast %25 : vector<1x32xf32> to vector<256x32xf32>
    %27 = arith.addf %23, %26 : vector<256x32xf32>
    %28 = arith.truncf %27 : vector<256x32xf32> to vector<256x32xbf16>
    %c0_23 = arith.constant 0 : index
    %c0_24 = arith.constant 0 : index
    %29 = vector.load %arg12[%c0_23, %c0_24] : memref<256x32xbf16, #tpu.memory_space<vmem>>, vector<256x32xbf16>
    tpu.vector_store %arg12[%c0_23, %c0_24], %28 {strides = array<i32>} : memref<256x32xbf16, #tpu.memory_space<vmem>>, vector<256x32xbf16>,
    return
  }
  func.func @transform_0(%arg0: i32) -> (i32, i32) {
    %c0_i32 = arith.constant 0 : i32
    %c0_i32_0 = arith.constant 0 : i32
    return %arg0, %c0_i32 : i32, i32
  }
  func.func @transform_1(%arg0: i32) -> (i32, i32) {
    %c0_i32 = arith.constant 0 : i32
    %c0_i32_0 = arith.constant 0 : i32
    return %arg0, %c0_i32 : i32, i32
  }
  func.func @transform_2(%arg0: i32) -> (i32, i32) {
    %c0_i32 = arith.constant 0 : i32
    %c0_i32_0 = arith.constant 0 : i32
    return %arg0, %c0_i32 : i32, i32
  }
  func.func @transform_3(%arg0: i32) -> (i32, i32) {
    %c0_i32 = arith.constant 0 : i32
    %c0_i32_0 = arith.constant 0 : i32
    %c0_i32_1 = arith.constant 0 : i32
    return %c0_i32, %c0_i32_0 : i32, i32
  }
  func.func @transform_4(%arg0: i32) -> (i32, i32) {
    %c0_i32 = arith.constant 0 : i32
    %c0_i32_0 = arith.constant 0 : i32
    %c0_i32_1 = arith.constant 0 : i32
    return %c0_i32, %c0_i32_0 : i32, i32
  }
  func.func @transform_5(%arg0: i32) -> (i32, i32) {
    %c0_i32 = arith.constant 0 : i32
    %c0_i32_0 = arith.constant 0 : i32
    %c0_i32_1 = arith.constant 0 : i32
    return %c0_i32, %c0_i32_0 : i32, i32
  }
  func.func @transform_6(%arg0: i32) -> (i32, i32) {
    %c0_i32 = arith.constant 0 : i32
    %c0_i32_0 = arith.constant 0 : i32
    %c0_i32_1 = arith.constant 0 : i32
    return %c0_i32, %c0_i32_0 : i32, i32
  }
  func.func @transform_7(%arg0: i32) -> (i32, i32) {
    %c0_i32 = arith.constant 0 : i32
    %c0_i32_0 = arith.constant 0 : i32
    %c0_i32_1 = arith.constant 0 : i32
    return %c0_i32, %c0_i32_0 : i32, i32
  }
  func.func @transform_8(%arg0: i32) -> (i32, i32) {
    %c0_i32 = arith.constant 0 : i32
    %c0_i32_0 = arith.constant 0 : i32
    %c0_i32_1 = arith.constant 0 : i32
    return %c0_i32, %c0_i32_0 : i32, i32
  }
  func.func @transform_9(%arg0: i32) -> (i32, i32) {
    %c0_i32 = arith.constant 0 : i32
    %c0_i32_0 = arith.constant 0 : i32
    return %arg0, %c0_i32 : i32, i32
  }
  func.func @transform_10(%arg0: i32) -> (i32, i32) {
    %c0_i32 = arith.constant 0 : i32
    %c0_i32_0 = arith.constant 0 : i32
    return %arg0, %c0_i32 : i32, i32
  }
  func.func @transform_11(%arg0: i32) -> (i32, i32) {
    %c0_i32 = arith.constant 0 : i32
    %c0_i32_0 = arith.constant 0 : i32
    return %arg0, %c0_i32 : i32, i32
  }
}

</mosaic_0001>

<bundles_post_ra>
// kernel: tpu_custom_call.1
= control target key start
LH: loop header
LB: loop body
LE: loop exit
PB: predicated region body
PF: predicated region fallthrough
CT: control target
= control target key end

     0   :  { %s1595_s17 = smov 0   ;;  %s2110_s0 = inlined_call_operand.vmem [shape: f32[512,32], index: 0, kind: input, shape index: {}]   ;;  %s2111_s1 = inlined_call_operand.vmem [shape: f32[512,32], index: 1, kind: input, shape index: {}]   ;;  %s2112_s2 = inlined_call_operand.vmem [shape: f32[512,32], index: 2, kind: input, shape index: {}]   ;;  %s2113_s3 = inlined_call_operand.vmem [shape: bf16[32,32], index: 3, kind: input, shape index: {}]   ;;  %s2114_s4 = inlined_call_operand.vmem [shape: bf16[32,32], index: 4, kind: input, shape index: {}]   ;;  %s2115_s5 = inlined_call_operand.vmem [shape: bf16[32,32], index: 5, kind: input, shape index: {}]   ;;  %s2116_s6 = inlined_call_operand.vmem [shape: bf16[1,32], index: 6, kind: input, shape index: {}]   ;;  %s2117_s7 = inlined_call_operand.vmem [shape: bf16[1,32], index: 7, kind: input, shape index: {}]   ;;  %s2118_s8 = inlined_call_operand.vmem [shape: bf16[1,32], index: 8, kind: input, shape index: {}]   ;;  %s2119_s9 = inlined_call_operand.vmem [shape: bf16[512,32], index: 9, kind: output, shape index: {0}]   ;;  %s2120_s10 = inlined_call_operand.vmem [shape: bf16[512,32], index: 10, kind: output, shape index: {1}]   ;;  %s2121_s11 = inlined_call_operand.vmem [shape: bf16[512,32], index: 11, kind: output, shape index: {2}]  }
   0x1 LB: > { %s1416_s18 = sadd.s32 4294967295, %s1533_s17   ;;  %p1420_p0 = scmp.ge.s32.totalorder %s1533_s17, 1  ;;  %s1533_s17 = sphi %s1595_s17, %s22_s17  }
   0x2   : > { %p365_p1 = scmp.lt.s32.totalorder %s1533_s17, 3 }
   0x4   : > { %p366_p2 = pnand %p1420_p0, %p365_p1 }
   0x5   : > { %s1421_s25 = sshll.u32 (!%p366_p2), %s1416_s18, 5 }
   0x6   : > { %369 = sbr.rel (%p366_p2) target bundleno = 342 (0x156), region = 56  ;;  %p426_p3 = scmp.lt.s32.totalorder (!%p366_p2), %s1421_s25, 63 }
   0xb   : > { %v1508_v0 = vld [vmem:[%s2113_s3 + $0x8] sm:$0xff]  ;;  %v1507_v3 = vld [vmem:[%s2113_s3] sm:$0xff]  ;;  %s2123_s25 = smov (!%p426_p3, %s1421_s25), 63  ;;  %vm529_vm0 = vcmask 261120   ;;  %vm699_vm1 = vcmask 257024  }
   0xc   : > { %v1510_v1 = vld [vmem:[%s2114_s4 + $0x8] sm:$0xff]  ;;  %584 = vmatpush.bf16.msra.mxu0 %v1508_v0  ;;  %1513 = vmatpush.bf16.msra.mxu3 %v1508_v0  ;;  %v1509_v4 = vld [vmem:[%s2114_s4] sm:$0xff]  ;;  %s1422_s13 = sshll.u32 %s2123_s25, 3  ;;  %s1757_s12 = sshll.u32 %s2123_s25, 2 }
   0xd   : > { %v1512_v2 = vld [vmem:[%s2115_s5 + $0x8] sm:$0xff]  ;;  %853 = vmatpush.bf16.msra.mxu1 %v1510_v1  ;;  %v1511_v5 = vld [vmem:[%s2115_s5] sm:$0xff]  ;;  %s1627_s16 = scalar_lea.vmem %s2110_s0, %s1422_s13  ;;  %s1632_s20 = scalar_lea.vmem %s2111_s1, %s1422_s13 }
   0xe   : > { %1121 = vmatpush.bf16.msra.mxu2 %v1512_v2  ;;  %v462_v6 = vld [vmem:[%s1627_s16] sm:$0xff]  ;;  %v463_v7 = vld [vmem:[%s1627_s16 + $0x8] sm:$0xff]  ;;  %s1640_s23 = scalar_lea.vmem %s2112_s2, %s1422_s13  ;;  %v464_v18 = vld [vmem:[%s1627_s16 + $0x10] sm:$0xff]  ;;  %s1764_s15 = scalar_lea.vmem %s2119_s9, %s1757_s12 }
   0xf   : > { %v486_v8 = vld [vmem:[%s1627_s16 + $0xc0] sm:$0xff]  ;;  %v494_v9 = vpack.c.bf16 %v463_v7, %v462_v6  ;;  %v487_v10 = vld [vmem:[%s1627_s16 + $0xc8] sm:$0xff]  ;;  %v465_v19 = vld [vmem:[%s1627_s16 + $0x18] sm:$0xff]  ;;  %s1771_s19 = scalar_lea.vmem %s2120_s10, %s1757_s12  ;;  %s1790_s24 = scalar_lea.vmem %s2121_s11, %s1757_s12 }
  0x10   : > { %585 = vmatpush.bf16.msra.mxu0 %v1507_v3  ;;  %1514 = vmatpush.bf16.msra.mxu3 %v1507_v3  ;;  %v732_v11 = vld [vmem:[%s1632_s20] sm:$0xff]  ;;  %v733_v12 = vld [vmem:[%s1632_s20 + $0x8] sm:$0xff]  ;;  %v506_v13 = vpack.c.bf16 %v487_v10, %v486_v8  ;;  %v488_v20 = vld [vmem:[%s1627_s16 + $0xd0] sm:$0xff]  ;;  %v495_v26 = vpack.c.bf16 %v465_v19, %v464_v18 }
  0x11   : > { %854 = vmatpush.bf16.msra.mxu1 %v1509_v4  ;;  %v764_v14 = vpack.c.bf16 %v733_v12, %v732_v11  ;;  %v1000_v15 = vld [vmem:[%s1640_s23] sm:$0xff]  ;;  %v1001_v16 = vld [vmem:[%s1640_s23 + $0x8] sm:$0xff]  ;;  %v489_v21 = vld [vmem:[%s1627_s16 + $0xd8] sm:$0xff] }
  0x12   : > { %1122 = vmatpush.bf16.msra.mxu2 %v1511_v5  ;;  %v1032_v17 = vpack.c.bf16 %v1001_v16, %v1000_v15  ;;  %v734_v22 = vld [vmem:[%s1632_s20 + $0x10] sm:$0xff]  ;;  %v735_v23 = vld [vmem:[%s1632_s20 + $0x18] sm:$0xff]  ;;  %v507_v27 = vpack.c.bf16 %v489_v21, %v488_v20  ;;  %v466_v30 = vld [vmem:[%s1627_s16 + $0x20] sm:$0xff] }
  0x13   : > { %1441 = vmatmul.msk.bf16.vlgmr.msra.gmra.mxu0 %vm529_vm0, %v494_v9  ;;  %1453 = vmatmul.msk.bf16.vlgmr.msra.gmra.mxu3 %vm529_vm0, %v506_v13  ;;  %v1002_v24 = vld [vmem:[%s1640_s23 + $0x10] sm:$0xff]  ;;  %v1003_v25 = vld [vmem:[%s1640_s23 + $0x18] sm:$0xff]  ;;  %v765_v28 = vpack.c.bf16 %v735_v23, %v734_v22  ;;  %v467_v31 = vld [vmem:[%s1627_s16 + $0x28] sm:$0xff] }
  0x14   : > { %1515 = vmatpush.bf16.msrb.mxu3 %v1510_v1  ;;  %1465 = vmatmul.msk.bf16.vlgmr.msra.gmra.mxu1 %vm529_vm0, %v764_v14  ;;  %v1033_v29 = vpack.c.bf16 %v1003_v25, %v1002_v24  ;;  %v490_v32 = vld [vmem:[%s1627_s16 + $0xe0] sm:$0xff]  ;;  %v491_v33 = vld [vmem:[%s1627_s16 + $0xe8] sm:$0xff]  ;;  %v496_v38 = vpack.c.bf16 %v467_v31, %v466_v30  ;;  %v468_v42 = vld [vmem:[%s1627_s16 + $0x30] sm:$0xff] }
  0x15   : > { %1489 = vmatmul.msk.bf16.vlgmr.msra.gmra.mxu2 %vm529_vm0, %v1032_v17  ;;  %v736_v34 = vld [vmem:[%s1632_s20 + $0x20] sm:$0xff]  ;;  %v737_v35 = vld [vmem:[%s1632_s20 + $0x28] sm:$0xff]  ;;  %v508_v39 = vpack.c.bf16 %v491_v33, %v490_v32  ;;  %v469_v43 = vld [vmem:[%s1627_s16 + $0x38] sm:$0xff] }
  0x16   : > { %v1004_v36 = vld [vmem:[%s1640_s23 + $0x20] sm:$0xff]  ;;  %v1005_v37 = vld [vmem:[%s1640_s23 + $0x28] sm:$0xff]  ;;  %v766_v40 = vpack.c.bf16 %v737_v35, %v736_v34  ;;  %v492_v44 = vld [vmem:[%s1627_s16 + $0xf0] sm:$0xff]  ;;  %v497_v50 = vpack.c.bf16 %v469_v43, %v468_v42 }
  0x17   : > { %v1034_v41 = vpack.c.bf16 %v1005_v37, %v1004_v36  ;;  %v493_v45 = vld [vmem:[%s1627_s16 + $0xf8] sm:$0xff]  ;;  %v738_v46 = vld [vmem:[%s1632_s20 + $0x30] sm:$0xff]  ;;  %v470_v54 = vld [vmem:[%s1627_s16 + $0x40] sm:$0xff] }
  0x18   : > { %1516 = vmatpush.bf16.msrb.mxu3 %v1509_v4  ;;  %v739_v47 = vld [vmem:[%s1632_s20 + $0x38] sm:$0xff]  ;;  %v1006_v48 = vld [vmem:[%s1640_s23 + $0x30] sm:$0xff]  ;;  %v509_v51 = vpack.c.bf16 %v493_v45, %v492_v44  ;;  %v471_v55 = vld [vmem:[%s1627_s16 + $0x48] sm:$0xff] }
  0x19   : > { %v1007_v49 = vld [vmem:[%s1640_s23 + $0x38] sm:$0xff]  ;;  %v767_v52 = vpack.c.bf16 %v739_v47, %v738_v46  ;;  %v740_v56 = vld [vmem:[%s1632_s20 + $0x40] sm:$0xff]  ;;  %v741_v57 = vld [vmem:[%s1632_s20 + $0x48] sm:$0xff]  ;;  %v498_v62 = vpack.c.bf16 %v471_v55, %v470_v54 }
  0x1a   : > { %v1035_v53 = vpack.c.bf16 %v1007_v49, %v1006_v48  ;;  %v756_v58 = vld [vmem:[%s1632_s20 + $0xc0] sm:$0xff]  ;;  %v757_v59 = vld [vmem:[%s1632_s20 + $0xc8] sm:$0xff]  ;;  %v768_v63 = vpack.c.bf16 %v741_v57, %v740_v56  ;;  %v473_v3 = vld [vmem:[%s1627_s16 + $0x58] sm:$0xff] }
  0x1b   : > { %v1008_v60 = vld [vmem:[%s1640_s23 + $0x40] sm:$0xff]  ;;  %v1009_v61 = vld [vmem:[%s1640_s23 + $0x48] sm:$0xff]  ;;  %v776_v0 = vpack.c.bf16 %v757_v59, %v756_v58  ;;  %v742_v4 = vld [vmem:[%s1632_s20 + $0x50] sm:$0xff] }
  0x1c   : > { %1517 = vmatpush.bf16.msra.mxu3 %v1512_v2  ;;  %v1036_v1 = vpack.c.bf16 %v1009_v61, %v1008_v60  ;;  %v472_v2 = vld [vmem:[%s1627_s16 + $0x50] sm:$0xff]  ;;  %v759_v7 = vld [vmem:[%s1632_s20 + $0xd8] sm:$0xff]  ;;  %v474_v14 = vld [vmem:[%s1627_s16 + $0x60] sm:$0xff] }
  0x1d   : > { %v758_v6 = vld [vmem:[%s1632_s20 + $0xd0] sm:$0xff]  ;;  %v1011_v9 = vld [vmem:[%s1640_s23 + $0x58] sm:$0xff]  ;;  %v499_v10 = vpack.c.bf16 %v473_v3, %v472_v2  ;;  %v475_v15 = vld [vmem:[%s1627_s16 + $0x68] sm:$0xff] }
  0x1e   : > { %v1010_v8 = vld [vmem:[%s1640_s23 + $0x50] sm:$0xff]  ;;  %v777_v12 = vpack.c.bf16 %v759_v7, %v758_v6  ;;  %v744_v16 = vld [vmem:[%s1632_s20 + $0x60] sm:$0xff]  ;;  %v745_v17 = vld [vmem:[%s1632_s20 + $0x68] sm:$0xff]  ;;  %v500_v22 = vpack.c.bf16 %v475_v15, %v474_v14 }
  0x1f   : > { %v1037_v13 = vpack.c.bf16 %v1011_v9, %v1010_v8  ;;  %v760_v18 = vld [vmem:[%s1632_s20 + $0xe0] sm:$0xff]  ;;  %v761_v19 = vld [vmem:[%s1632_s20 + $0xe8] sm:$0xff]  ;;  %v770_v23 = vpack.c.bf16 %v745_v17, %v744_v16  ;;  %v762_v30 = vld [vmem:[%s1632_s20 + $0xf0] sm:$0xff] }
  0x20   : > { %1518 = vmatpush.bf16.msra.mxu3 %v1511_v5  ;;  %v743_v5 = vld [vmem:[%s1632_s20 + $0x58] sm:$0xff]  ;;  %v1012_v20 = vld [vmem:[%s1640_s23 + $0x60] sm:$0xff]  ;;  %v1013_v21 = vld [vmem:[%s1640_s23 + $0x68] sm:$0xff]  ;;  %v778_v24 = vpack.c.bf16 %v761_v19, %v760_v18 }
  0x21   : > { %v769_v11 = vpack.c.bf16 %v743_v5, %v742_v4  ;;  %v1038_v25 = vpack.c.bf16 %v1013_v21, %v1012_v20  ;;  %v763_v31 = vld [vmem:[%s1632_s20 + $0xf8] sm:$0xff]  ;;  %v1014_v32 = vld [vmem:[%s1640_s23 + $0x70] sm:$0xff]  ;;  %v478_v42 = vld [vmem:[%s1627_s16 + $0x80] sm:$0xff] }
  0x22   : > { %v1015_v33 = vld [vmem:[%s1640_s23 + $0x78] sm:$0xff]  ;;  %v779_v36 = vpack.c.bf16 %v763_v31, %v762_v30  ;;  %v479_v43 = vld [vmem:[%s1627_s16 + $0x88] sm:$0xff]  ;;  %v748_v44 = vld [vmem:[%s1632_s20 + $0x80] sm:$0xff] }
  0x23   : > { %1442 = vmatmul.msk.bf16.gmra.mxu0 %vm529_vm0, %v495_v26  ;;  %1454 = vmatmul.msk.bf16.gmra.mxu3 %vm529_vm0, %v507_v27  ;;  %v476_v26 = vld [vmem:[%s1627_s16 + $0x70] sm:$0xff]  ;;  %v477_v27 = vld [vmem:[%s1627_s16 + $0x78] sm:$0xff]  ;;  %v1039_v37 = vpack.c.bf16 %v1015_v33, %v1014_v32  ;;  %v749_v46 = vld [vmem:[%s1632_s20 + $0x88] sm:$0xff] }
  0x24   : > { %1466 = vmatmul.msk.bf16.gmra.mxu1 %vm529_vm0, %v765_v28  ;;  %v746_v28 = vld [vmem:[%s1632_s20 + $0x70] sm:$0xff]  ;;  %v501_v34 = vpack.c.bf16 %v477_v27, %v476_v26  ;;  %v1024_v47 = vld [vmem:[%s1640_s23 + $0xc0] sm:$0xff]  ;;  %v1025_v48 = vld [vmem:[%s1640_s23 + $0xc8] sm:$0xff]  ;;  %v772_v55 = vpack.c.bf16 %v749_v46, %v748_v44 }
  0x25   : > { %1490 = vmatmul.msk.bf16.gmra.mxu2 %vm529_vm0, %v1033_v29  ;;  %v747_v29 = vld [vmem:[%s1632_s20 + $0x78] sm:$0xff]  ;;  %v1044_v56 = vpack.c.bf16 %v1025_v48, %v1024_v47  ;;  %v750_v15 = vld [vmem:[%s1632_s20 + $0x90] sm:$0xff] }
  0x26   : > { %v771_v35 = vpack.c.bf16 %v747_v29, %v746_v28  ;;  %v481_v14 = vld [vmem:[%s1627_s16 + $0x98] sm:$0xff]  ;;  %v1026_v17 = vld [vmem:[%s1640_s23 + $0xd0] sm:$0xff] }
  0x27   : > { %v751_v16 = vld [vmem:[%s1632_s20 + $0x98] sm:$0xff]  ;;  %v1018_v19 = vld [vmem:[%s1640_s23 + $0x90] sm:$0xff] }
  0x28   : > { %v1027_v18 = vld [vmem:[%s1640_s23 + $0xd8] sm:$0xff]  ;;  %v773_v26 = vpack.c.bf16 %v751_v16, %v750_v15 }
  0x29   : > { %v1019_v20 = vld [vmem:[%s1640_s23 + $0x98] sm:$0xff]  ;;  %v1045_v27 = vpack.c.bf16 %v1027_v18, %v1026_v17 }
  0x2a   : > { %v1041_v31 = vpack.c.bf16 %v1019_v20, %v1018_v19 }
  0x33   : > { %1443 = vmatmul.msk.bf16.gmra.mxu0 %vm529_vm0, %v496_v38  ;;  %1455 = vmatmul.msk.bf16.gmra.mxu3 %vm529_vm0, %v508_v39  ;;  %v514_v38 = vld [vmem:[%s2116_s6] sm:$0x1] }
  0x34   : > { %1467 = vmatmul.msk.bf16.gmra.mxu1 %vm529_vm0, %v766_v40  ;;  %v784_v39 = vld [vmem:[%s2117_s7] sm:$0x1]  ;;  %v515_v40 = vunpack.c.l.bf16 %v514_v38 }
  0x35   : > { %1491 = vmatmul.msk.bf16.gmra.mxu2 %vm529_vm0, %v1034_v41  ;;  %v785_v41 = vunpack.c.l.bf16 %v784_v39 }
  0x36   : > { %v1744_v45 = vperm.slane %v515_v40, 0 }
  0x37   : > { %v1749_v49 = vperm.slane %v785_v41, 0 }
  0x43   : > { %1444 = vmatmul.msk.bf16.gmra.mxu0 %vm529_vm0, %v497_v50  ;;  %1456 = vmatmul.msk.bf16.gmra.mxu3 %vm529_vm0, %v509_v51  ;;  %v1016_v50 = vld [vmem:[%s1640_s23 + $0x80] sm:$0xff]  ;;  %v1017_v51 = vld [vmem:[%s1640_s23 + $0x88] sm:$0xff] }
  0x44   : > { %1468 = vmatmul.msk.bf16.gmra.mxu1 %vm529_vm0, %v767_v52  ;;  %v1052_v52 = vld [vmem:[%s2118_s8] sm:$0x1]  ;;  %v1040_v59 = vpack.c.bf16 %v1017_v51, %v1016_v50 }
  0x45   : > { %1492 = vmatmul.msk.bf16.gmra.mxu2 %vm529_vm0, %v1035_v53  ;;  %v502_v53 = vpack.c.bf16 %v479_v43, %v478_v42  ;;  %v1053_v60 = vunpack.c.l.bf16 %v1052_v52  ;;  %v482_v51 = vld [vmem:[%s1627_s16 + $0xa0] sm:$0xff]  ;;  %v483_v52 = vld [vmem:[%s1627_s16 + $0xa8] sm:$0xff] }
  0x53   : > { %1445 = vmatmul.msk.bf16.gmra.mxu0 %vm529_vm0, %v498_v62  ;;  %1477 = vmatmul.msk.bf16.vlgmr.msrb.gmra.mxu3 %vm529_vm0, %v776_v0  ;;  %v1779_v0 = vperm.slane %v1053_v60, 0  ;;  %v504_v60 = vpack.c.bf16 %v483_v52, %v482_v51 }
  0x54   : > { %1469 = vmatmul.msk.bf16.gmra.mxu1 %vm529_vm0, %v768_v63 }
  0x55   : > { %1493 = vmatmul.msk.bf16.gmra.mxu2 %vm529_vm0, %v1036_v1 }
  0x63   : > { %1446 = vmatmul.msk.bf16.gmra.mxu0 %vm529_vm0, %v499_v10  ;;  %1478 = vmatmul.msk.bf16.gmra.mxu3 %vm529_vm0, %v777_v12 }
  0x64   : > { %1470 = vmatmul.msk.bf16.gmra.mxu1 %vm529_vm0, %v769_v11 }
  0x65   : > { %1494 = vmatmul.msk.bf16.gmra.mxu2 %vm529_vm0, %v1037_v13  ;;  %v480_v13 = vld [vmem:[%s1627_s16 + $0x90] sm:$0xff] }
  0x73   : > { %1447 = vmatmul.msk.bf16.gmra.mxu0 %vm529_vm0, %v500_v22  ;;  %1479 = vmatmul.msk.bf16.gmra.mxu3 %vm529_vm0, %v778_v24  ;;  %v503_v22 = vpack.c.bf16 %v481_v14, %v480_v13 }
  0x74   : > { %1471 = vmatmul.msk.bf16.gmra.mxu1 %vm529_vm0, %v770_v23 }
  0x75   : > { %1495 = vmatmul.msk.bf16.gmra.mxu2 %vm529_vm0, %v1038_v25 }
  0x83   : > { %1448 = vmatmul.msk.bf16.gmra.mxu0 %vm529_vm0, %v501_v34  ;;  %1480 = vmatmul.msk.bf16.gmra.mxu3 %vm529_vm0, %v779_v36 }
  0x84   : > { %1472 = vmatmul.msk.bf16.gmra.mxu1 %vm529_vm0, %v771_v35 }
  0x85   : > { %1496 = vmatmul.msk.bf16.gmra.mxu2 %vm529_vm0, %v1039_v37 }
  0x90   : > { %v587_v54 = vpop.f32.mrf.mxu0 }
  0x91   : > { %v588_v57 = vadd.f32 %v587_v54, %v1744_v45  ;;  %v856_v58 = vpop.f32.mrf.mxu1  ;;  %v753_v54 = vld [vmem:[%s1632_s20 + $0xa8] sm:$0xff] }
  0x92   : > { %v857_v61 = vadd.f32 %v856_v58, %v1749_v49  ;;  %v1021_v58 = vld [vmem:[%s1640_s23 + $0xa8] sm:$0xff] }
  0x93   : > { %v667_v62 = vpack.c.bf16 %v588_v57, %v588_v57  ;;  %1449 = vmatmul.msk.bf16.gmra.mxu0 %vm529_vm0, %v502_v53  ;;  %1501 = vmatmul.msk.bf16.vlgmr.msra.gmra.mxu3 %vm529_vm0, %v1044_v56  ;;  %v752_v53 = vld [vmem:[%s1632_s20 + $0xa0] sm:$0xff]  ;;  %v1029_v56 = vld [vmem:[%s1640_s23 + $0xe8] sm:$0xff] }
  0x94   : > { %v936_v63 = vpack.c.bf16 %v857_v61, %v857_v61  ;;  %1473 = vmatmul.msk.bf16.gmra.mxu1 %vm529_vm0, %v772_v55  ;;  %v1028_v55 = vld [vmem:[%s1640_s23 + $0xe0] sm:$0xff] }
  0x95   : > { %700 = vst.msk [vmem:[%s1764_s15] sm:$0xf] %vm699_vm1, %v667_v62  ;;  %1497 = vmatmul.msk.bf16.gmra.mxu2 %vm529_vm0, %v1040_v59  ;;  %v1020_v57 = vld [vmem:[%s1640_s23 + $0xa0] sm:$0xff] }
  0x96   : > { %968 = vst.msk [vmem:[%s1771_s19] sm:$0xf] %vm699_vm1, %v936_v63  ;;  %v647_v1 = vpop.f32.mrf.mxu3 }
  0x97   : > { %v648_v2 = vadd.f32 %v647_v1, %v1744_v45  ;;  %v774_v1 = vpack.c.bf16 %v753_v54, %v752_v53 }
  0x98   : > { %v1124_v3 = vpop.f32.mrf.mxu2  ;;  %v589_v4 = vpop.f32.mrf.mxu0 }
  0x99   : > { %v1125_v5 = vadd.f32 %v1124_v3, %v1779_v0  ;;  %v590_v6 = vadd.f32 %v589_v4, %v1744_v45  ;;  %v858_v7 = vpop.f32.mrf.mxu1  ;;  %v691_v8 = vpack.c.bf16 %v648_v2, %v648_v2  ;;  %v1046_v2 = vpack.c.bf16 %v1029_v56, %v1028_v55 }
  0x9a   : > { %v859_v9 = vadd.f32 %v858_v7, %v1749_v49 }
  0x9b   : > { %v1204_v10 = vpack.c.bf16 %v1125_v5, %v1125_v5  ;;  %v668_v11 = vpack.c.bf16 %v590_v6, %v590_v6  ;;  %724 = vst.msk [vmem:[%s1764_s15 + $0x60] sm:$0xf] %vm699_vm1, %v691_v8  ;;  %v1042_v6 = vpack.c.bf16 %v1021_v58, %v1020_v57 }
  0x9c   : > { %v937_v12 = vpack.c.bf16 %v859_v9, %v859_v9 }
  0x9d   : > { %1236 = vst.msk [vmem:[%s1790_s24] sm:$0xf] %vm699_vm1, %v1204_v10 }
  0x9e   : > { %701 = vst.msk [vmem:[%s1764_s15 + $0x4] sm:$0xf] %vm699_vm1, %v668_v11  ;;  %v649_v21 = vpop.f32.mrf.mxu3 }
  0x9f   : > { %969 = vst.msk [vmem:[%s1771_s19 + $0x4] sm:$0xf] %vm699_vm1, %v937_v12  ;;  %v650_v23 = vadd.f32 %v649_v21, %v1744_v45 }
  0xa0   : > { %v1126_v24 = vpop.f32.mrf.mxu2  ;;  %v592_v25 = vpop.f32.mrf.mxu0 }
  0xa1   : > { %v1127_v28 = vadd.f32 %v1126_v24, %v1779_v0  ;;  %v593_v29 = vadd.f32 %v592_v25, %v1744_v45  ;;  %v861_v30 = vpop.f32.mrf.mxu1  ;;  %v692_v32 = vpack.c.bf16 %v650_v23, %v650_v23  ;;  %v484_v24 = vld [vmem:[%s1627_s16 + $0xb0] sm:$0xff]  ;;  %v485_v25 = vld [vmem:[%s1627_s16 + $0xb8] sm:$0xff] }
  0xa2   : > { %v862_v33 = vadd.f32 %v861_v30, %v1749_v49  ;;  %v1022_v30 = vld [vmem:[%s1640_s23 + $0xb0] sm:$0xff] }
  0xa3   : > { %v1205_v34 = vpack.c.bf16 %v1127_v28, %v1127_v28  ;;  %v669_v35 = vpack.c.bf16 %v593_v29, %v593_v29  ;;  %1450 = vmatmul.msk.bf16.gmra.mxu0 %vm529_vm0, %v503_v22  ;;  %725 = vst.msk [vmem:[%s1764_s15 + $0x64] sm:$0xf] %vm699_vm1, %v692_v32  ;;  %1502 = vmatmul.msk.bf16.gmra.mxu3 %vm529_vm0, %v1045_v27  ;;  %v755_v27 = vld [vmem:[%s1632_s20 + $0xb8] sm:$0xff]  ;;  %v1030_v28 = vld [vmem:[%s1640_s23 + $0xf0] sm:$0xff] }
  0xa4   : > { %v938_v36 = vpack.c.bf16 %v862_v33, %v862_v33  ;;  %1474 = vmatmul.msk.bf16.gmra.mxu1 %vm529_vm0, %v773_v26  ;;  %v754_v26 = vld [vmem:[%s1632_s20 + $0xb0] sm:$0xff]  ;;  %v1031_v29 = vld [vmem:[%s1640_s23 + $0xf8] sm:$0xff]  ;;  %v505_v33 = vpack.c.bf16 %v485_v25, %v484_v24 }
  0xa5   : > { %1237 = vst.msk [vmem:[%s1790_s24 + $0x4] sm:$0xf] %vm699_vm1, %v1205_v34  ;;  %1498 = vmatmul.msk.bf16.gmra.mxu2 %vm529_vm0, %v1041_v31  ;;  %v1023_v31 = vld [vmem:[%s1640_s23 + $0xb8] sm:$0xff] }
  0xa6   : > { %702 = vst.msk [vmem:[%s1764_s15 + $0x8] sm:$0xf] %vm699_vm1, %v669_v35  ;;  %v652_v37 = vpop.f32.mrf.mxu3 }
  0xa7   : > { %970 = vst.msk [vmem:[%s1771_s19 + $0x8] sm:$0xf] %vm699_vm1, %v938_v36  ;;  %v653_v38 = vadd.f32 %v652_v37, %v1744_v45  ;;  %v775_v37 = vpack.c.bf16 %v755_v27, %v754_v26 }
  0xa8   : > { %v1129_v39 = vpop.f32.mrf.mxu2  ;;  %v594_v40 = vpop.f32.mrf.mxu0 }
  0xa9   : > { %v1130_v41 = vadd.f32 %v1129_v39, %v1779_v0  ;;  %v595_v42 = vadd.f32 %v594_v40, %v1744_v45  ;;  %v863_v43 = vpop.f32.mrf.mxu1  ;;  %v693_v44 = vpack.c.bf16 %v653_v38, %v653_v38  ;;  %v1047_v38 = vpack.c.bf16 %v1031_v29, %v1030_v28 }
  0xaa   : > { %v864_v46 = vadd.f32 %v863_v43, %v1749_v49 }
  0xab   : > { %v1206_v47 = vpack.c.bf16 %v1130_v41, %v1130_v41  ;;  %v670_v48 = vpack.c.bf16 %v595_v42, %v595_v42  ;;  %726 = vst.msk [vmem:[%s1764_s15 + $0x68] sm:$0xf] %vm699_vm1, %v693_v44  ;;  %v1043_v42 = vpack.c.bf16 %v1023_v31, %v1022_v30 }
  0xac   : > { %v939_v50 = vpack.c.bf16 %v864_v46, %v864_v46 }
  0xad   : > { %1238 = vst.msk [vmem:[%s1790_s24 + $0x8] sm:$0xf] %vm699_vm1, %v1206_v47 }
  0xae   : > { %703 = vst.msk [vmem:[%s1764_s15 + $0xc] sm:$0xf] %vm699_vm1, %v670_v48  ;;  %v654_v59 = vpop.f32.mrf.mxu3 }
  0xaf   : > { %971 = vst.msk [vmem:[%s1771_s19 + $0xc] sm:$0xf] %vm699_vm1, %v939_v50  ;;  %v655_v61 = vadd.f32 %v654_v59, %v1744_v45 }
  0xb0   : > { %v1131_v62 = vpop.f32.mrf.mxu2  ;;  %v597_v63 = vpop.f32.mrf.mxu0 }
  0xb1   : > { %v1132_v3 = vadd.f32 %v1131_v62, %v1779_v0  ;;  %v598_v4 = vadd.f32 %v597_v63, %v1744_v45  ;;  %v866_v5 = vpop.f32.mrf.mxu1  ;;  %v694_v7 = vpack.c.bf16 %v655_v61, %v655_v61 }
  0xb2   : > { %v867_v8 = vadd.f32 %v866_v5, %v1749_v49 }
  0xb3   : > { %v1207_v9 = vpack.c.bf16 %v1132_v3, %v1132_v3  ;;  %v671_v10 = vpack.c.bf16 %v598_v4, %v598_v4  ;;  %1451 = vmatmul.msk.bf16.gmra.mxu0 %vm529_vm0, %v504_v60  ;;  %727 = vst.msk [vmem:[%s1764_s15 + $0x6c] sm:$0xf] %vm699_vm1, %v694_v7  ;;  %1503 = vmatmul.msk.bf16.gmra.mxu3 %vm529_vm0, %v1046_v2 }
  0xb4   : > { %v940_v11 = vpack.c.bf16 %v867_v8, %v867_v8  ;;  %1475 = vmatmul.msk.bf16.gmra.mxu1 %vm529_vm0, %v774_v1 }
  0xb5   : > { %1239 = vst.msk [vmem:[%s1790_s24 + $0xc] sm:$0xf] %vm699_vm1, %v1207_v9  ;;  %1499 = vmatmul.msk.bf16.gmra.mxu2 %vm529_vm0, %v1042_v6 }
  0xb6   : > { %704 = vst.msk [vmem:[%s1764_s15 + $0x10] sm:$0xf] %vm699_vm1, %v671_v10  ;;  %v657_v12 = vpop.f32.mrf.mxu3 }
  0xb7   : > { %972 = vst.msk [vmem:[%s1771_s19 + $0x10] sm:$0xf] %vm699_vm1, %v940_v11  ;;  %v658_v13 = vadd.f32 %v657_v12, %v1744_v45 }
  0xb8   : > { %v1134_v14 = vpop.f32.mrf.mxu2  ;;  %v599_v15 = vpop.f32.mrf.mxu0 }
  0xb9   : > { %v1135_v16 = vadd.f32 %v1134_v14, %v1779_v0  ;;  %v600_v17 = vadd.f32 %v599_v15, %v1744_v45  ;;  %v868_v18 = vpop.f32.mrf.mxu1  ;;  %v695_v19 = vpack.c.bf16 %v658_v13, %v658_v13 }
  0xba   : > { %v869_v20 = vadd.f32 %v868_v18, %v1749_v49 }
  0xbb   : > { %v1208_v21 = vpack.c.bf16 %v1135_v16, %v1135_v16  ;;  %v672_v22 = vpack.c.bf16 %v600_v17, %v600_v17  ;;  %728 = vst.msk [vmem:[%s1764_s15 + $0x70] sm:$0xf] %vm699_vm1, %v695_v19 }
  0xbc   : > { %v941_v23 = vpack.c.bf16 %v869_v20, %v869_v20 }
  0xbd   : > { %1240 = vst.msk [vmem:[%s1790_s24 + $0x10] sm:$0xf] %vm699_vm1, %v1208_v21 }
  0xbe   : > { %705 = vst.msk [vmem:[%s1764_s15 + $0x14] sm:$0xf] %vm699_vm1, %v672_v22  ;;  %v659_v32 = vpop.f32.mrf.mxu3 }
  0xbf   : > { %973 = vst.msk [vmem:[%s1771_s19 + $0x14] sm:$0xf] %vm699_vm1, %v941_v23  ;;  %v660_v34 = vadd.f32 %v659_v32, %v1744_v45 }
  0xc0   : > { %v1136_v35 = vpop.f32.mrf.mxu2  ;;  %v602_v36 = vpop.f32.mrf.mxu0 }
  0xc1   : > { %v1137_v39 = vadd.f32 %v1136_v35, %v1779_v0  ;;  %v603_v40 = vadd.f32 %v602_v36, %v1744_v45  ;;  %v871_v41 = vpop.f32.mrf.mxu1  ;;  %v696_v43 = vpack.c.bf16 %v660_v34, %v660_v34 }
  0xc2   : > { %v872_v44 = vadd.f32 %v871_v41, %v1749_v49 }
  0xc3   : > { %v1209_v46 = vpack.c.bf16 %v1137_v39, %v1137_v39  ;;  %v673_v47 = vpack.c.bf16 %v603_v40, %v603_v40  ;;  %1452 = vmatmul.msk.bf16.gmra.mxu0 %vm529_vm0, %v505_v33  ;;  %729 = vst.msk [vmem:[%s1764_s15 + $0x74] sm:$0xf] %vm699_vm1, %v696_v43  ;;  %1504 = vmatmul.msk.bf16.gmra.mxu3 %vm529_vm0, %v1047_v38 }
  0xc4   : > { %v942_v48 = vpack.c.bf16 %v872_v44, %v872_v44  ;;  %1476 = vmatmul.msk.bf16.gmra.mxu1 %vm529_vm0, %v775_v37 }
  0xc5   : > { %1241 = vst.msk [vmem:[%s1790_s24 + $0x14] sm:$0xf] %vm699_vm1, %v1209_v46  ;;  %1500 = vmatmul.msk.bf16.gmra.mxu2 %vm529_vm0, %v1043_v42 }
  0xc6   : > { %706 = vst.msk [vmem:[%s1764_s15 + $0x18] sm:$0xf] %vm699_vm1, %v673_v47  ;;  %v662_v50 = vpop.f32.mrf.mxu3 }
  0xc7   : > { %974 = vst.msk [vmem:[%s1771_s19 + $0x18] sm:$0xf] %vm699_vm1, %v942_v48  ;;  %v663_v51 = vadd.f32 %v662_v50, %v1744_v45 }
  0xc8   : > { %v1139_v52 = vpop.f32.mrf.mxu2  ;;  %v604_v53 = vpop.f32.mrf.mxu0 }
  0xc9   : > { %v1140_v54 = vadd.f32 %v1139_v52, %v1779_v0  ;;  %v605_v55 = vadd.f32 %v604_v53, %v1744_v45  ;;  %v873_v56 = vpop.f32.mrf.mxu1  ;;  %v697_v57 = vpack.c.bf16 %v663_v51, %v663_v51 }
  0xca   : > { %v874_v58 = vadd.f32 %v873_v56, %v1749_v49 }
  0xcb   : > { %v1210_v59 = vpack.c.bf16 %v1140_v54, %v1140_v54  ;;  %v674_v60 = vpack.c.bf16 %v605_v55, %v605_v55  ;;  %730 = vst.msk [vmem:[%s1764_s15 + $0x78] sm:$0xf] %vm699_vm1, %v697_v57 }
  0xcc   : > { %v943_v61 = vpack.c.bf16 %v874_v58, %v874_v58 }
  0xcd   : > { %1242 = vst.msk [vmem:[%s1790_s24 + $0x18] sm:$0xf] %vm699_vm1, %v1210_v59 }
  0xce   : > { %707 = vst.msk [vmem:[%s1764_s15 + $0x1c] sm:$0xf] %vm699_vm1, %v674_v60  ;;  %v664_v62 = vpop.f32.mrf.mxu3 }
  0xcf   : > { %975 = vst.msk [vmem:[%s1771_s19 + $0x1c] sm:$0xf] %vm699_vm1, %v943_v61  ;;  %v665_v63 = vadd.f32 %v664_v62, %v1744_v45 }
  0xd0   : > { %v1141_v1 = vpop.f32.mrf.mxu2  ;;  %v607_v2 = vpop.f32.mrf.mxu0 }
  0xd1   : > { %v1142_v3 = vadd.f32 %v1141_v1, %v1779_v0  ;;  %v608_v4 = vadd.f32 %v607_v2, %v1744_v45  ;;  %v876_v5 = vpop.f32.mrf.mxu1  ;;  %v698_v6 = vpack.c.bf16 %v665_v63, %v665_v63 }
  0xd2   : > { %v877_v7 = vadd.f32 %v876_v5, %v1749_v49 }
  0xd3   : > { %v1211_v8 = vpack.c.bf16 %v1142_v3, %v1142_v3  ;;  %v675_v9 = vpack.c.bf16 %v608_v4, %v608_v4  ;;  %731 = vst.msk [vmem:[%s1764_s15 + $0x7c] sm:$0xf] %vm699_vm1, %v698_v6 }
  0xd4   : > { %v944_v10 = vpack.c.bf16 %v877_v7, %v877_v7 }
  0xd5   : > { %1243 = vst.msk [vmem:[%s1790_s24 + $0x1c] sm:$0xf] %vm699_vm1, %v1211_v8 }
  0xd6   : > { %708 = vst.msk [vmem:[%s1764_s15 + $0x20] sm:$0xf] %vm699_vm1, %v675_v9  ;;  %v916_v11 = vpop.f32.mrf.mxu3 }
  0xd7   : > { %976 = vst.msk [vmem:[%s1771_s19 + $0x20] sm:$0xf] %vm699_vm1, %v944_v10  ;;  %v917_v12 = vadd.f32 %v916_v11, %v1749_v49 }
  0xd8   : > { %v1144_v13 = vpop.f32.mrf.mxu2  ;;  %v609_v14 = vpop.f32.mrf.mxu0 }
  0xd9   : > { %v1145_v15 = vadd.f32 %v1144_v13, %v1779_v0  ;;  %v610_v16 = vadd.f32 %v609_v14, %v1744_v45  ;;  %v878_v17 = vpop.f32.mrf.mxu1  ;;  %v960_v18 = vpack.c.bf16 %v917_v12, %v917_v12 }
  0xda   : > { %v879_v19 = vadd.f32 %v878_v17, %v1749_v49 }
  0xdb   : > { %v1212_v20 = vpack.c.bf16 %v1145_v15, %v1145_v15  ;;  %v676_v21 = vpack.c.bf16 %v610_v16, %v610_v16  ;;  %992 = vst.msk [vmem:[%s1771_s19 + $0x60] sm:$0xf] %vm699_vm1, %v960_v18 }
  0xdc   : > { %v945_v22 = vpack.c.bf16 %v879_v19, %v879_v19 }
  0xdd   : > { %1244 = vst.msk [vmem:[%s1790_s24 + $0x20] sm:$0xf] %vm699_vm1, %v1212_v20 }
  0xde   : > { %709 = vst.msk [vmem:[%s1764_s15 + $0x24] sm:$0xf] %vm699_vm1, %v676_v21  ;;  %v918_v23 = vpop.f32.mrf.mxu3 }
  0xdf   : > { %977 = vst.msk [vmem:[%s1771_s19 + $0x24] sm:$0xf] %vm699_vm1, %v945_v22  ;;  %v919_v24 = vadd.f32 %v918_v23, %v1749_v49 }
  0xe0   : > { %v1146_v25 = vpop.f32.mrf.mxu2  ;;  %v612_v26 = vpop.f32.mrf.mxu0 }
  0xe1   : > { %v1147_v27 = vadd.f32 %v1146_v25, %v1779_v0  ;;  %v613_v28 = vadd.f32 %v612_v26, %v1744_v45  ;;  %v881_v29 = vpop.f32.mrf.mxu1  ;;  %v961_v30 = vpack.c.bf16 %v919_v24, %v919_v24 }
  0xe2   : > { %v882_v31 = vadd.f32 %v881_v29, %v1749_v49 }
  0xe3   : > { %v1213_v32 = vpack.c.bf16 %v1147_v27, %v1147_v27  ;;  %v677_v33 = vpack.c.bf16 %v613_v28, %v613_v28  ;;  %993 = vst.msk [vmem:[%s1771_s19 + $0x64] sm:$0xf] %vm699_vm1, %v961_v30 }
  0xe4   : > { %v946_v34 = vpack.c.bf16 %v882_v31, %v882_v31 }
  0xe5   : > { %1245 = vst.msk [vmem:[%s1790_s24 + $0x24] sm:$0xf] %vm699_vm1, %v1213_v32 }
  0xe6   : > { %710 = vst.msk [vmem:[%s1764_s15 + $0x28] sm:$0xf] %vm699_vm1, %v677_v33  ;;  %v921_v35 = vpop.f32.mrf.mxu3 }
  0xe7   : > { %978 = vst.msk [vmem:[%s1771_s19 + $0x28] sm:$0xf] %vm699_vm1, %v946_v34  ;;  %v922_v36 = vadd.f32 %v921_v35, %v1749_v49 }
  0xe8   : > { %v1149_v37 = vpop.f32.mrf.mxu2  ;;  %v614_v38 = vpop.f32.mrf.mxu0 }
  0xe9   : > { %v1150_v39 = vadd.f32 %v1149_v37, %v1779_v0  ;;  %v615_v40 = vadd.f32 %v614_v38, %v1744_v45  ;;  %v883_v41 = vpop.f32.mrf.mxu1  ;;  %v962_v42 = vpack.c.bf16 %v922_v36, %v922_v36 }
  0xea   : > { %v884_v43 = vadd.f32 %v883_v41, %v1749_v49 }
  0xeb   : > { %v1214_v44 = vpack.c.bf16 %v1150_v39, %v1150_v39  ;;  %v678_v46 = vpack.c.bf16 %v615_v40, %v615_v40  ;;  %994 = vst.msk [vmem:[%s1771_s19 + $0x68] sm:$0xf] %vm699_vm1, %v962_v42 }
  0xec   : > { %v947_v47 = vpack.c.bf16 %v884_v43, %v884_v43 }
  0xed   : > { %1246 = vst.msk [vmem:[%s1790_s24 + $0x28] sm:$0xf] %vm699_vm1, %v1214_v44 }
  0xee   : > { %711 = vst.msk [vmem:[%s1764_s15 + $0x2c] sm:$0xf] %vm699_vm1, %v678_v46  ;;  %v923_v48 = vpop.f32.mrf.mxu3 }
  0xef   : > { %979 = vst.msk [vmem:[%s1771_s19 + $0x2c] sm:$0xf] %vm699_vm1, %v947_v47  ;;  %v924_v50 = vadd.f32 %v923_v48, %v1749_v49 }
  0xf0   : > { %v1151_v51 = vpop.f32.mrf.mxu2  ;;  %v617_v52 = vpop.f32.mrf.mxu0 }
  0xf1   : > { %v1152_v53 = vadd.f32 %v1151_v51, %v1779_v0  ;;  %v618_v54 = vadd.f32 %v617_v52, %v1744_v45  ;;  %v886_v55 = vpop.f32.mrf.mxu1  ;;  %v963_v56 = vpack.c.bf16 %v924_v50, %v924_v50 }
  0xf2   : > { %v887_v57 = vadd.f32 %v886_v55, %v1749_v49 }
  0xf3   : > { %v1215_v58 = vpack.c.bf16 %v1152_v53, %v1152_v53  ;;  %v679_v59 = vpack.c.bf16 %v618_v54, %v618_v54  ;;  %995 = vst.msk [vmem:[%s1771_s19 + $0x6c] sm:$0xf] %vm699_vm1, %v963_v56 }
  0xf4   : > { %v948_v60 = vpack.c.bf16 %v887_v57, %v887_v57 }
  0xf5   : > { %1247 = vst.msk [vmem:[%s1790_s24 + $0x2c] sm:$0xf] %vm699_vm1, %v1215_v58 }
  0xf6   : > { %712 = vst.msk [vmem:[%s1764_s15 + $0x30] sm:$0xf] %vm699_vm1, %v679_v59  ;;  %v926_v61 = vpop.f32.mrf.mxu3 }
  0xf7   : > { %980 = vst.msk [vmem:[%s1771_s19 + $0x30] sm:$0xf] %vm699_vm1, %v948_v60  ;;  %v927_v62 = vadd.f32 %v926_v61, %v1749_v49 }
  0xf8   : > { %v1154_v63 = vpop.f32.mrf.mxu2  ;;  %v619_v1 = vpop.f32.mrf.mxu0 }
  0xf9   : > { %v1155_v2 = vadd.f32 %v1154_v63, %v1779_v0  ;;  %v620_v3 = vadd.f32 %v619_v1, %v1744_v45  ;;  %v888_v4 = vpop.f32.mrf.mxu1  ;;  %v964_v5 = vpack.c.bf16 %v927_v62, %v927_v62 }
  0xfa   : > { %v889_v6 = vadd.f32 %v888_v4, %v1749_v49 }
  0xfb   : > { %v1216_v7 = vpack.c.bf16 %v1155_v2, %v1155_v2  ;;  %v680_v8 = vpack.c.bf16 %v620_v3, %v620_v3  ;;  %996 = vst.msk [vmem:[%s1771_s19 + $0x70] sm:$0xf] %vm699_vm1, %v964_v5 }
  0xfc   : > { %v949_v9 = vpack.c.bf16 %v889_v6, %v889_v6 }
  0xfd   : > { %1248 = vst.msk [vmem:[%s1790_s24 + $0x30] sm:$0xf] %vm699_vm1, %v1216_v7 }
  0xfe   : > { %713 = vst.msk [vmem:[%s1764_s15 + $0x34] sm:$0xf] %vm699_vm1, %v680_v8  ;;  %v928_v10 = vpop.f32.mrf.mxu3 }
  0xff   : > { %981 = vst.msk [vmem:[%s1771_s19 + $0x34] sm:$0xf] %vm699_vm1, %v949_v9  ;;  %v929_v11 = vadd.f32 %v928_v10, %v1749_v49 }
 0x100   : > { %v1156_v12 = vpop.f32.mrf.mxu2  ;;  %v622_v13 = vpop.f32.mrf.mxu0 }
 0x101   : > { %v1157_v14 = vadd.f32 %v1156_v12, %v1779_v0  ;;  %v623_v15 = vadd.f32 %v622_v13, %v1744_v45  ;;  %v891_v16 = vpop.f32.mrf.mxu1  ;;  %v965_v17 = vpack.c.bf16 %v929_v11, %v929_v11 }
 0x102   : > { %v892_v18 = vadd.f32 %v891_v16, %v1749_v49 }
 0x103   : > { %v1217_v19 = vpack.c.bf16 %v1157_v14, %v1157_v14  ;;  %v681_v20 = vpack.c.bf16 %v623_v15, %v623_v15  ;;  %997 = vst.msk [vmem:[%s1771_s19 + $0x74] sm:$0xf] %vm699_vm1, %v965_v17 }
 0x104   : > { %v950_v21 = vpack.c.bf16 %v892_v18, %v892_v18 }
 0x105   : > { %1249 = vst.msk [vmem:[%s1790_s24 + $0x34] sm:$0xf] %vm699_vm1, %v1217_v19 }
 0x106   : > { %714 = vst.msk [vmem:[%s1764_s15 + $0x38] sm:$0xf] %vm699_vm1, %v681_v20  ;;  %v931_v22 = vpop.f32.mrf.mxu3 }
 0x107   : > { %982 = vst.msk [vmem:[%s1771_s19 + $0x38] sm:$0xf] %vm699_vm1, %v950_v21  ;;  %v932_v23 = vadd.f32 %v931_v22, %v1749_v49 }
 0x108   : > { %v1159_v24 = vpop.f32.mrf.mxu2  ;;  %v624_v25 = vpop.f32.mrf.mxu0 }
 0x109   : > { %v1160_v26 = vadd.f32 %v1159_v24, %v1779_v0  ;;  %v625_v27 = vadd.f32 %v624_v25, %v1744_v45  ;;  %v893_v28 = vpop.f32.mrf.mxu1  ;;  %v966_v29 = vpack.c.bf16 %v932_v23, %v932_v23 }
 0x10a   : > { %v894_v30 = vadd.f32 %v893_v28, %v1749_v49 }
 0x10b   : > { %v1218_v31 = vpack.c.bf16 %v1160_v26, %v1160_v26  ;;  %v682_v32 = vpack.c.bf16 %v625_v27, %v625_v27  ;;  %998 = vst.msk [vmem:[%s1771_s19 + $0x78] sm:$0xf] %vm699_vm1, %v966_v29 }
 0x10c   : > { %v951_v33 = vpack.c.bf16 %v894_v30, %v894_v30 }
 0x10d   : > { %1250 = vst.msk [vmem:[%s1790_s24 + $0x38] sm:$0xf] %vm699_vm1, %v1218_v31 }
 0x10e   : > { %715 = vst.msk [vmem:[%s1764_s15 + $0x3c] sm:$0xf] %vm699_vm1, %v682_v32  ;;  %v933_v34 = vpop.f32.mrf.mxu3 }
 0x10f   : > { %983 = vst.msk [vmem:[%s1771_s19 + $0x3c] sm:$0xf] %vm699_vm1, %v951_v33  ;;  %v934_v35 = vadd.f32 %v933_v34, %v1749_v49 }
 0x110   : > { %v1161_v36 = vpop.f32.mrf.mxu2  ;;  %v627_v37 = vpop.f32.mrf.mxu0 }
 0x111   : > { %v1162_v38 = vadd.f32 %v1161_v36, %v1779_v0  ;;  %v628_v39 = vadd.f32 %v627_v37, %v1744_v45  ;;  %v896_v40 = vpop.f32.mrf.mxu1  ;;  %v967_v41 = vpack.c.bf16 %v934_v35, %v934_v35 }
 0x112   : > { %v897_v42 = vadd.f32 %v896_v40, %v1749_v49 }
 0x113   : > { %v1219_v43 = vpack.c.bf16 %v1162_v38, %v1162_v38  ;;  %v683_v44 = vpack.c.bf16 %v628_v39, %v628_v39  ;;  %999 = vst.msk [vmem:[%s1771_s19 + $0x7c] sm:$0xf] %vm699_vm1, %v967_v41 }
 0x114   : > { %v952_v46 = vpack.c.bf16 %v897_v42, %v897_v42 }
 0x115   : > { %1251 = vst.msk [vmem:[%s1790_s24 + $0x3c] sm:$0xf] %vm699_vm1, %v1219_v43 }
 0x116   : > { %716 = vst.msk [vmem:[%s1764_s15 + $0x40] sm:$0xf] %vm699_vm1, %v683_v44  ;;  %v1184_v47 = vpop.f32.mrf.mxu3 }
 0x117   : > { %984 = vst.msk [vmem:[%s1771_s19 + $0x40] sm:$0xf] %vm699_vm1, %v952_v46  ;;  %v1185_v50 = vadd.f32 %v1184_v47, %v1779_v0 }
 0x118   : > { %v1164_v48 = vpop.f32.mrf.mxu2  ;;  %v629_v51 = vpop.f32.mrf.mxu0 }
 0x119   : > { %v1165_v52 = vadd.f32 %v1164_v48, %v1779_v0  ;;  %v630_v53 = vadd.f32 %v629_v51, %v1744_v45  ;;  %v898_v54 = vpop.f32.mrf.mxu1  ;;  %v1228_v55 = vpack.c.bf16 %v1185_v50, %v1185_v50 }
 0x11a   : > { %v899_v56 = vadd.f32 %v898_v54, %v1749_v49 }
 0x11b   : > { %v1220_v57 = vpack.c.bf16 %v1165_v52, %v1165_v52  ;;  %v684_v58 = vpack.c.bf16 %v630_v53, %v630_v53  ;;  %1260 = vst.msk [vmem:[%s1790_s24 + $0x60] sm:$0xf] %vm699_vm1, %v1228_v55 }
 0x11c   : > { %v953_v59 = vpack.c.bf16 %v899_v56, %v899_v56 }
 0x11d   : > { %1252 = vst.msk [vmem:[%s1790_s24 + $0x40] sm:$0xf] %vm699_vm1, %v1220_v57 }
 0x11e   : > { %717 = vst.msk [vmem:[%s1764_s15 + $0x44] sm:$0xf] %vm699_vm1, %v684_v58  ;;  %v1186_v60 = vpop.f32.mrf.mxu3 }
 0x11f   : > { %985 = vst.msk [vmem:[%s1771_s19 + $0x44] sm:$0xf] %vm699_vm1, %v953_v59  ;;  %v1187_v62 = vadd.f32 %v1186_v60, %v1779_v0 }
 0x120   : > { %v1166_v61 = vpop.f32.mrf.mxu2  ;;  %v632_v63 = vpop.f32.mrf.mxu0 }
 0x121   : > { %v1167_v1 = vadd.f32 %v1166_v61, %v1779_v0  ;;  %v633_v2 = vadd.f32 %v632_v63, %v1744_v45  ;;  %v901_v3 = vpop.f32.mrf.mxu1  ;;  %v1229_v4 = vpack.c.bf16 %v1187_v62, %v1187_v62 }
 0x122   : > { %v902_v5 = vadd.f32 %v901_v3, %v1749_v49 }
 0x123   : > { %v1221_v6 = vpack.c.bf16 %v1167_v1, %v1167_v1  ;;  %v685_v7 = vpack.c.bf16 %v633_v2, %v633_v2  ;;  %1261 = vst.msk [vmem:[%s1790_s24 + $0x64] sm:$0xf] %vm699_vm1, %v1229_v4 }
 0x124   : > { %v954_v8 = vpack.c.bf16 %v902_v5, %v902_v5 }
 0x125   : > { %1253 = vst.msk [vmem:[%s1790_s24 + $0x44] sm:$0xf] %vm699_vm1, %v1221_v6 }
 0x126   : > { %718 = vst.msk [vmem:[%s1764_s15 + $0x48] sm:$0xf] %vm699_vm1, %v685_v7  ;;  %v1189_v9 = vpop.f32.mrf.mxu3 }
 0x127   : > { %986 = vst.msk [vmem:[%s1771_s19 + $0x48] sm:$0xf] %vm699_vm1, %v954_v8  ;;  %v1190_v11 = vadd.f32 %v1189_v9, %v1779_v0 }
 0x128   : > { %v1169_v10 = vpop.f32.mrf.mxu2  ;;  %v634_v12 = vpop.f32.mrf.mxu0 }
 0x129   : > { %v1170_v13 = vadd.f32 %v1169_v10, %v1779_v0  ;;  %v635_v14 = vadd.f32 %v634_v12, %v1744_v45  ;;  %v903_v15 = vpop.f32.mrf.mxu1  ;;  %v1230_v16 = vpack.c.bf16 %v1190_v11, %v1190_v11 }
 0x12a   : > { %v904_v17 = vadd.f32 %v903_v15, %v1749_v49 }
 0x12b   : > { %v1222_v18 = vpack.c.bf16 %v1170_v13, %v1170_v13  ;;  %v686_v19 = vpack.c.bf16 %v635_v14, %v635_v14  ;;  %1262 = vst.msk [vmem:[%s1790_s24 + $0x68] sm:$0xf] %vm699_vm1, %v1230_v16 }
 0x12c   : > { %v955_v20 = vpack.c.bf16 %v904_v17, %v904_v17 }
 0x12d   : > { %1254 = vst.msk [vmem:[%s1790_s24 + $0x48] sm:$0xf] %vm699_vm1, %v1222_v18 }
 0x12e   : > { %719 = vst.msk [vmem:[%s1764_s15 + $0x4c] sm:$0xf] %vm699_vm1, %v686_v19  ;;  %v1191_v21 = vpop.f32.mrf.mxu3 }
 0x12f   : > { %987 = vst.msk [vmem:[%s1771_s19 + $0x4c] sm:$0xf] %vm699_vm1, %v955_v20  ;;  %v1192_v23 = vadd.f32 %v1191_v21, %v1779_v0 }
 0x130   : > { %v1171_v22 = vpop.f32.mrf.mxu2  ;;  %v637_v24 = vpop.f32.mrf.mxu0 }
 0x131   : > { %v1172_v25 = vadd.f32 %v1171_v22, %v1779_v0  ;;  %v638_v26 = vadd.f32 %v637_v24, %v1744_v45  ;;  %v906_v27 = vpop.f32.mrf.mxu1  ;;  %v1231_v28 = vpack.c.bf16 %v1192_v23, %v1192_v23 }
 0x132   : > { %v907_v29 = vadd.f32 %v906_v27, %v1749_v49 }
 0x133   : > { %v1223_v30 = vpack.c.bf16 %v1172_v25, %v1172_v25  ;;  %v687_v31 = vpack.c.bf16 %v638_v26, %v638_v26  ;;  %1263 = vst.msk [vmem:[%s1790_s24 + $0x6c] sm:$0xf] %vm699_vm1, %v1231_v28 }
 0x134   : > { %v956_v32 = vpack.c.bf16 %v907_v29, %v907_v29 }
 0x135   : > { %1255 = vst.msk [vmem:[%s1790_s24 + $0x4c] sm:$0xf] %vm699_vm1, %v1223_v30 }
 0x136   : > { %720 = vst.msk [vmem:[%s1764_s15 + $0x50] sm:$0xf] %vm699_vm1, %v687_v31  ;;  %v1194_v33 = vpop.f32.mrf.mxu3 }
 0x137   : > { %988 = vst.msk [vmem:[%s1771_s19 + $0x50] sm:$0xf] %vm699_vm1, %v956_v32  ;;  %v1195_v35 = vadd.f32 %v1194_v33, %v1779_v0 }
 0x138   : > { %v1174_v34 = vpop.f32.mrf.mxu2  ;;  %v639_v36 = vpop.f32.mrf.mxu0 }
 0x139   : > { %v1175_v37 = vadd.f32 %v1174_v34, %v1779_v0  ;;  %v640_v38 = vadd.f32 %v639_v36, %v1744_v45  ;;  %v908_v39 = vpop.f32.mrf.mxu1  ;;  %v1232_v40 = vpack.c.bf16 %v1195_v35, %v1195_v35 }
 0x13a   : > { %v909_v41 = vadd.f32 %v908_v39, %v1749_v49 }
 0x13b   : > { %v1224_v42 = vpack.c.bf16 %v1175_v37, %v1175_v37  ;;  %v688_v43 = vpack.c.bf16 %v640_v38, %v640_v38  ;;  %1264 = vst.msk [vmem:[%s1790_s24 + $0x70] sm:$0xf] %vm699_vm1, %v1232_v40 }
 0x13c   : > { %v957_v44 = vpack.c.bf16 %v909_v41, %v909_v41 }
 0x13d   : > { %1256 = vst.msk [vmem:[%s1790_s24 + $0x50] sm:$0xf] %vm699_vm1, %v1224_v42 }
 0x13e   : > { %721 = vst.msk [vmem:[%s1764_s15 + $0x54] sm:$0xf] %vm699_vm1, %v688_v43  ;;  %v1196_v46 = vpop.f32.mrf.mxu3 }
 0x13f   : > { %989 = vst.msk [vmem:[%s1771_s19 + $0x54] sm:$0xf] %vm699_vm1, %v957_v44  ;;  %v1197_v48 = vadd.f32 %v1196_v46, %v1779_v0 }
 0x140   : > { %v1176_v47 = vpop.f32.mrf.mxu2  ;;  %v642_v50 = vpop.f32.mrf.mxu0 }
 0x141   : > { %v1177_v51 = vadd.f32 %v1176_v47, %v1779_v0  ;;  %v643_v52 = vadd.f32 %v642_v50, %v1744_v45  ;;  %v911_v53 = vpop.f32.mrf.mxu1  ;;  %v1233_v54 = vpack.c.bf16 %v1197_v48, %v1197_v48 }
 0x142   : > { %v912_v55 = vadd.f32 %v911_v53, %v1749_v49 }
 0x143   : > { %v1225_v56 = vpack.c.bf16 %v1177_v51, %v1177_v51  ;;  %v689_v57 = vpack.c.bf16 %v643_v52, %v643_v52  ;;  %1265 = vst.msk [vmem:[%s1790_s24 + $0x74] sm:$0xf] %vm699_vm1, %v1233_v54 }
 0x144   : > { %v958_v58 = vpack.c.bf16 %v912_v55, %v912_v55 }
 0x145   : > { %1257 = vst.msk [vmem:[%s1790_s24 + $0x54] sm:$0xf] %vm699_vm1, %v1225_v56 }
 0x146   : > { %722 = vst.msk [vmem:[%s1764_s15 + $0x58] sm:$0xf] %vm699_vm1, %v689_v57  ;;  %v1199_v59 = vpop.f32.mrf.mxu3 }
 0x147   : > { %990 = vst.msk [vmem:[%s1771_s19 + $0x58] sm:$0xf] %vm699_vm1, %v958_v58  ;;  %v1200_v61 = vadd.f32 %v1199_v59, %v1779_v0 }
 0x148   : > { %v1179_v60 = vpop.f32.mrf.mxu2  ;;  %v644_v62 = vpop.f32.mrf.mxu0 }
 0x149   : > { %v1180_v63 = vadd.f32 %v1179_v60, %v1779_v0  ;;  %v645_v1 = vadd.f32 %v644_v62, %v1744_v45  ;;  %v913_v2 = vpop.f32.mrf.mxu1  ;;  %v1234_v3 = vpack.c.bf16 %v1200_v61, %v1200_v61 }
 0x14a   : > { %v914_v4 = vadd.f32 %v913_v2, %v1749_v49 }
 0x14b   : > { %v1226_v5 = vpack.c.bf16 %v1180_v63, %v1180_v63  ;;  %v690_v6 = vpack.c.bf16 %v645_v1, %v645_v1  ;;  %1266 = vst.msk [vmem:[%s1790_s24 + $0x78] sm:$0xf] %vm699_vm1, %v1234_v3 }
 0x14c   : > { %v959_v7 = vpack.c.bf16 %v914_v4, %v914_v4 }
 0x14d   : > { %1258 = vst.msk [vmem:[%s1790_s24 + $0x58] sm:$0xf] %vm699_vm1, %v1226_v5 }
 0x14e   : > { %723 = vst.msk [vmem:[%s1764_s15 + $0x5c] sm:$0xf] %vm699_vm1, %v690_v6  ;;  %v1201_v8 = vpop.f32.mrf.mxu3 }
 0x14f   : > { %991 = vst.msk [vmem:[%s1771_s19 + $0x5c] sm:$0xf] %vm699_vm1, %v959_v7  ;;  %v1202_v45 = vadd.f32 %v1201_v8, %v1779_v0 }
 0x150   : > { %v1181_v9 = vpop.f32.mrf.mxu2 }
 0x151   : > { %v1182_v10 = vadd.f32 %v1181_v9, %v1779_v0  ;;  %v1235_v11 = vpack.c.bf16 %v1202_v45, %v1202_v45 }
 0x153   : > { %v1227_v12 = vpack.c.bf16 %v1182_v10, %v1182_v10  ;;  %1267 = vst.msk [vmem:[%s1790_s24 + $0x7c] sm:$0xf] %vm699_vm1, %v1235_v11 }
 0x155   : > { %1259 = vst.msk [vmem:[%s1790_s24 + $0x5c] sm:$0xf] %vm699_vm1, %v1227_v12 }
 0x156 PF: > { %s22_s17 = sadd.s32 1, %s1533_s17  }
 0x157   : > { %p19_p4 = scmp.ge.s32.totalorder %s22_s17, 4  }
 0x159   :  { %21 = sbr.rel (!%p19_p4) target bundleno = 1 (0x1), region = 116 }

</bundles_post_ra>
